<compile_context>
chip_gen: v6e
topology: v6e:2x2x1
jax: 0.10.0
libtpu: 0.0.40
codegen_flags: <defaults>
</compile_context>

<pallas_src>
import functools

import jax
import jax.numpy as jnp
from jax.experimental import pallas as pl
from jax.experimental.pallas import tpu as pltpu

AFFINITY_MAX = -0.0
AFFINITY_MIN = -17.4

_LANES = 128
_MAX_TILE_ROWS = 2048   # 2048*128*4B = 1 MiB per input block; 2 in x 2 bufs = 4 MiB VMEM
_NUM_CORES = 2          # v7x megacore split; degenerates to a serial loop on v5e/v6e


def _affinity_mse_kernel(pred_ref, true_ref, out_ref, acc_ref, *,
                         n_valid, tiles_per_core, tile_rows):
    # pred_ref, true_ref: (tile_rows, 128) blocks in VMEM (native dtype)
    # out_ref: (1, 1) f32 SMEM block, one per core (written once at the end)
    # acc_ref: (tile_rows, 128) f32 VMEM accumulator (per core)
    c = pl.program_id(0)      # core / row-range split ("parallel")
    i = pl.program_id(1)      # row-tile within this core's range ("arbitrary")
    n_i = pl.num_programs(1)

    @pl.when(i == 0)
    def _():
        acc_ref[...] = jnp.zeros_like(acc_ref)

    pred = pred_ref[...].astype(jnp.float32)
    tru = true_ref[...].astype(jnp.float32)

    # scale_affinity: 1 - (dg - min)/(max - min), clamped to [0, 1]
    inv_range = jnp.float32(1.0 / (AFFINITY_MAX - AFFINITY_MIN))
    scaled = 1.0 - (tru - jnp.float32(AFFINITY_MIN)) * inv_range
    scaled = jnp.clip(scaled, 0.0, 1.0)
    diff = pred - scaled
    sq = diff * diff

    # Logical (un-clamped) tile index -> global flat offset of this block.
    tile_idx = c * tiles_per_core + i
    tile_start = tile_idx * (tile_rows * _LANES)
    needs_mask = tile_start + tile_rows * _LANES > n_valid

    # Interior tiles: plain VPU accumulate, no masking work at all.
    @pl.when(jnp.logical_not(needs_mask))
    def _():
        acc_ref[...] += sq

    # Boundary / out-of-range tiles only: mask by global flat element index.
    @pl.when(needs_mask)
    def _():
        row = jax.lax.broadcasted_iota(jnp.int32, sq.shape, 0)
        col = jax.lax.broadcasted_iota(jnp.int32, sq.shape, 1)
        flat_idx = tile_start + row * _LANES + col
        acc_ref[...] += jnp.where(flat_idx < n_valid, sq, 0.0)

    # Single cross-lane reduce + SMEM store, once per core.
    @pl.when(i == n_i - 1)
    def _():
        out_ref[0, 0] = jnp.sum(acc_ref[...])


def affinity_loss(predicted_affinity, true_affinity):
    """MSE(pred, scale_affinity(true)) with PyTorch AffinityLoss squeeze semantics."""
    pred = predicted_affinity
    if pred.ndim > 1 and pred.shape[-1] == 1:   # torch .squeeze(-1)
        pred = pred[..., 0]
    tru = true_affinity
    if tru.ndim > 1:                            # torch scaled[:, 0]
        tru = tru[:, 0]

    pred = pred.reshape(-1)
    tru = tru.reshape(-1)
    n = pred.shape[0]

    # Lane-dense (rows, 128) layout. Pad only the ragged <128 lane tail
    # (masked in-kernel); if n is already lane-aligned the reshape is free.
    rows = -(-n // _LANES)
    n_pad = rows * _LANES
    if n_pad != n:
        pred = jnp.pad(pred, (0, n_pad - n))
        tru = jnp.pad(tru, (0, n_pad - n))
    pred2 = pred.reshape(rows, _LANES)
    tru2 = tru.reshape(rows, _LANES)

    tile_rows = min(rows, _MAX_TILE_ROWS)
    num_tiles = pl.cdiv(rows, tile_rows)
    num_cores = min(_NUM_CORES, num_tiles)
    tiles_per_core = pl.cdiv(num_tiles, num_cores)
    max_tile = num_tiles - 1

    if num_cores * tiles_per_core == num_tiles:
        def in_map(c, i):
            return (c * tiles_per_core + i, 0)
    else:
        # Odd tile count split across 2 cores: clamp so no block is fully
        # out of bounds; over-range tiles are zeroed by the in-kernel mask.
        def in_map(c, i):
            return (jnp.minimum(c * tiles_per_core + i, max_tile), 0)

    kernel = functools.partial(
        _affinity_mse_kernel, n_valid=n,
        tiles_per_core=tiles_per_core, tile_rows=tile_rows)

    partials = pl.pallas_call(
        kernel,
        out_shape=jax.ShapeDtypeStruct((num_cores, 1), jnp.float32),
        grid=(num_cores, tiles_per_core),
        in_specs=[
            pl.BlockSpec((tile_rows, _LANES), in_map),
            pl.BlockSpec((tile_rows, _LANES), in_map),
        ],
        out_specs=pl.BlockSpec((1, 1), lambda c, i: (c, 0),
                               memory_space=pltpu.MemorySpace.SMEM),
        scratch_shapes=[pltpu.VMEM((tile_rows, _LANES), jnp.float32)],
        compiler_params=pltpu.CompilerParams(
            dimension_semantics=("parallel", "arbitrary")),
        cost_estimate=pl.CostEstimate(
            flops=7 * n_pad,
            transcendentals=0,
            bytes_accessed=2 * n_pad * pred2.dtype.itemsize + 8),
    )(pred2, tru2)

    # Sum the per-core partials and divide once (better numerics than per-tile 1/n).
    # TODO(synk): n == 0 yields nan (0/0), matching torch MSELoss on empty input.
    return jnp.sum(partials) / jnp.float32(n)


if __name__ == "__main__":
    key = jax.random.PRNGKey(0)
    k1, k2 = jax.random.split(key)

    B = 8  # batch of affinity values, [B, 1] to exercise the squeeze paths
    predicted_affinity = jax.random.uniform(k1, (B, 1), dtype=jnp.float32)
    true_affinity = jax.random.uniform(
        k2, (B, 1), dtype=jnp.float32, minval=AFFINITY_MIN, maxval=AFFINITY_MAX)

    loss = affinity_loss(predicted_affinity, true_affinity)
    jax.block_until_ready(loss)

    # plain-JAX reference
    scaled_ref = jnp.clip(
        1.0 - (true_affinity[:, 0] - AFFINITY_MIN) / (AFFINITY_MAX - AFFINITY_MIN),
        0.0, 1.0)
    ref = jnp.mean((predicted_affinity[:, 0] - scaled_ref) ** 2)
    assert jnp.allclose(loss, ref, atol=1e-6, rtol=1e-6), (loss, ref)

    print("KERNEL_OK")
</pallas_src>

<mosaic_0001>
module attributes {stable_mosaic.version = 11 : i64} {
  func.func @_affinity_mse_kernel(%arg0: i32, %arg1: i32, %arg2: memref<1x128xf32, #tpu.memory_space<vmem>>, %arg3: memref<1x128xf32, #tpu.memory_space<vmem>>, %arg4: memref<1x1xf32, #tpu.memory_space<smem>>, %arg5: memref<1x128xf32, #tpu.memory_space<vmem>>) attributes {dimension_semantics = [#tpu.dimension_semantics<parallel>, #tpu.dimension_semantics<arbitrary>], iteration_bounds = array<i64: 1, 1>, scalar_prefetch = 0 : i64, scratch_operands = 1 : i64, tpu.core_type = #tpu.core_type<tc>, window_params = [{transform_indices = @transform_0, window_bounds = array<i64: 1, 128>}, {transform_indices = @transform_1, window_bounds = array<i64: 1, 128>}, {transform_indices = @transform_2, window_bounds = array<i64: 1, 1>}]} {
    %c0_i32 = arith.constant 0 : i32
    %0 = arith.cmpi eq, %arg1, %c0_i32 : i32
    %1 = arith.extui %0 : i1 to i32
    %c0_i32_0 = arith.constant 0 : i32
    %2 = arith.cmpi ne, %1, %c0_i32_0 : i32
    scf.if %2 {
      %cst_13 = arith.constant 0.000000e+00 : f32
      %30 = vector.broadcast %cst_13 : f32 to vector<1x128xf32>
      %c0_14 = arith.constant 0 : index
      %c0_15 = arith.constant 0 : index
      %31 = vector.load %arg5[%c0_14, %c0_15] : memref<1x128xf32, #tpu.memory_space<vmem>>, vector<1x128xf32>
      tpu.vector_store %arg5[%c0_14, %c0_15], %30 {strides = array<i32>} : memref<1x128xf32, #tpu.memory_space<vmem>>, vector<1x128xf32>,
    } else {
    }
    %c0 = arith.constant 0 : index
    %c0_1 = arith.constant 0 : index
    %3 = vector.load %arg2[%c0, %c0_1] : memref<1x128xf32, #tpu.memory_space<vmem>>, vector<1x128xf32>
    %c0_2 = arith.constant 0 : index
    %c0_3 = arith.constant 0 : index
    %4 = vector.load %arg3[%c0_2, %c0_3] : memref<1x128xf32, #tpu.memory_space<vmem>>, vector<1x128xf32>
    %cst = arith.constant -1.740000e+01 : f32
    %5 = vector.broadcast %cst : f32 to vector<1x128xf32>
    %6 = arith.subf %4, %5 : vector<1x128xf32>
    %cst_4 = arith.constant 0.0574712642 : f32
    %7 = vector.broadcast %cst_4 : f32 to vector<1x128xf32>
    %8 = arith.mulf %6, %7 : vector<1x128xf32>
    %cst_5 = arith.constant 1.000000e+00 : f32
    %9 = vector.broadcast %cst_5 : f32 to vector<1x128xf32>
    %10 = arith.subf %9, %8 : vector<1x128xf32>
    %cst_6 = arith.constant 0.000000e+00 : f32
    %cst_7 = arith.constant 1.000000e+00 : f32
    %11 = vector.broadcast %cst_6 : f32 to vector<1x128xf32>
    %12 = arith.maximumf %11, %10 : vector<1x128xf32>
    %13 = vector.broadcast %cst_7 : f32 to vector<1x128xf32>
    %14 = arith.minimumf %13, %12 : vector<1x128xf32>
    %15 = arith.subf %3, %14 : vector<1x128xf32>
    %16 = arith.mulf %15, %15 : vector<1x128xf32>
    %c1_i32 = arith.constant 1 : i32
    %17 = arith.muli %arg0, %c1_i32 : i32
    %18 = arith.addi %17, %arg1 : i32
    %c128_i32 = arith.constant 128 : i32
    %19 = arith.muli %18, %c128_i32 : i32
    %c128_i32_8 = arith.constant 128 : i32
    %20 = arith.addi %19, %c128_i32_8 : i32
    %c8_i32 = arith.constant 8 : i32
    %21 = arith.cmpi sgt, %20, %c8_i32 : i32
    %true = arith.constant true
    %22 = arith.xori %21, %true : i1
    %23 = arith.extui %22 : i1 to i32
    %c0_i32_9 = arith.constant 0 : i32
    %24 = arith.cmpi ne, %23, %c0_i32_9 : i32
    scf.if %24 {
      %c0_13 = arith.constant 0 : index
      %c0_14 = arith.constant 0 : index
      %30 = vector.load %arg5[%c0_13, %c0_14] : memref<1x128xf32, #tpu.memory_space<vmem>>, vector<1x128xf32>
      %31 = arith.addf %30, %16 : vector<1x128xf32>
      %c0_15 = arith.constant 0 : index
      %c0_16 = arith.constant 0 : index
      %32 = vector.load %arg5[%c0_15, %c0_16] : memref<1x128xf32, #tpu.memory_space<vmem>>, vector<1x128xf32>
      tpu.vector_store %arg5[%c0_15, %c0_16], %31 {strides = array<i32>} : memref<1x128xf32, #tpu.memory_space<vmem>>, vector<1x128xf32>,
    } else {
    }
    %25 = arith.extui %21 : i1 to i32
    %c0_i32_10 = arith.constant 0 : i32
    %26 = arith.cmpi ne, %25, %c0_i32_10 : i32
    scf.if %26 {
      %30 = tpu.iota {dimensions = array<i32: 0>} : vector<1x128xi32>
      %31 = tpu.iota {dimensions = array<i32: 1>} : vector<1x128xi32>
      %c128_i32_13 = arith.constant 128 : i32
      %32 = vector.broadcast %c128_i32_13 : i32 to vector<1x128xi32>
      %33 = arith.muli %30, %32 : vector<1x128xi32>
      %34 = vector.broadcast %19 : i32 to vector<1x128xi32>
      %35 = arith.addi %34, %33 : vector<1x128xi32>
      %36 = arith.addi %35, %31 : vector<1x128xi32>
      %c0_14 = arith.constant 0 : index
      %c0_15 = arith.constant 0 : index
      %37 = vector.load %arg5[%c0_14, %c0_15] : memref<1x128xf32, #tpu.memory_space<vmem>>, vector<1x128xf32>
      %c8_i32_16 = arith.constant 8 : i32
      %38 = vector.broadcast %c8_i32_16 : i32 to vector<1x128xi32>
      %39 = arith.cmpi slt, %36, %38 : vector<1x128xi32>
      %cst_17 = arith.constant 0.000000e+00 : f32
      %40 = vector.broadcast %cst_17 : f32 to vector<1x128xf32>
      %41 = arith.select %39, %16, %40 : vector<1x128xi1>, vector<1x128xf32>
      %42 = arith.addf %37, %41 : vector<1x128xf32>
      %c0_18 = arith.constant 0 : index
      %c0_19 = arith.constant 0 : index
      %43 = vector.load %arg5[%c0_18, %c0_19] : memref<1x128xf32, #tpu.memory_space<vmem>>, vector<1x128xf32>
      tpu.vector_store %arg5[%c0_18, %c0_19], %42 {strides = array<i32>} : memref<1x128xf32, #tpu.memory_space<vmem>>, vector<1x128xf32>,
    } else {
    }
    %c0_i32_11 = arith.constant 0 : i32
    %27 = arith.cmpi eq, %arg1, %c0_i32_11 : i32
    %28 = arith.extui %27 : i1 to i32
    %c0_i32_12 = arith.constant 0 : i32
    %29 = arith.cmpi ne, %28, %c0_i32_12 : i32
    scf.if %29 {
      %c0_13 = arith.constant 0 : index
      %c0_14 = arith.constant 0 : index
      %30 = vector.load %arg5[%c0_13, %c0_14] : memref<1x128xf32, #tpu.memory_space<vmem>>, vector<1x128xf32>
      %31 = vector.shape_cast %30 : vector<1x128xf32> to vector<1x1x128xf32>
      %cst_15 = arith.constant dense<0.000000e+00> : vector<1xf32>
      %32 = vector.multi_reduction <add>, %31, %cst_15 [1, 2] : vector<1x1x128xf32> to vector<1xf32>
      %33 = vector.shape_cast %32 : vector<1xf32> to vector<1x1x1xf32>
      %34 = vector.extract %33[0, 0, 0] : f32 from vector<1x1x1xf32>
      %c0_16 = arith.constant 0 : index
      %c0_17 = arith.constant 0 : index
      %35 = memref.load %arg4[%c0_16, %c0_17] : memref<1x1xf32, #tpu.memory_space<smem>>
      memref.store %34, %arg4[%c0_16, %c0_17] : memref<1x1xf32, #tpu.memory_space<smem>>
    } else {
    }
    return
  }
  func.func @transform_0(%arg0: i32, %arg1: i32) -> (i32, i32) {
    %c1_i32 = arith.constant 1 : i32
    %0 = arith.muli %arg0, %c1_i32 : i32
    %1 = arith.addi %0, %arg1 : i32
    %c0_i32 = arith.constant 0 : i32
    %c0_i32_0 = arith.constant 0 : i32
    return %1, %c0_i32 : i32, i32
  }
  func.func @transform_1(%arg0: i32, %arg1: i32) -> (i32, i32) {
    %c1_i32 = arith.constant 1 : i32
    %0 = arith.muli %arg0, %c1_i32 : i32
    %1 = arith.addi %0, %arg1 : i32
    %c0_i32 = arith.constant 0 : i32
    %c0_i32_0 = arith.constant 0 : i32
    return %1, %c0_i32 : i32, i32
  }
  func.func @transform_2(%arg0: i32, %arg1: i32) -> (i32, i32) {
    %c0_i32 = arith.constant 0 : i32
    %c0_i32_0 = arith.constant 0 : i32
    return %arg0, %c0_i32 : i32, i32
  }
}

</mosaic_0001>

<bundles_post_ra>
// kernel: tpu_custom_call.1
= control target key start
LH: loop header
LB: loop body
LE: loop exit
PB: predicated region body
PF: predicated region fallthrough
CT: control target
= control target key end

     0   :  { %7 = vsyncpa [#allocation4], 0  ;;  %s182_s0 = inlined_call_operand.hbm [shape: f32[1,128], index: 0, kind: input, shape index: {}]   ;;  %s183_s1 = inlined_call_operand.vmem [shape: f32[1,128], index: 1, kind: input, shape index: {}]   ;;  %s184_s2 = inlined_call_operand.hbm [shape: f32[1,1], index: 2, kind: output, shape index: {}]  }
   0x1   :  { %8 = vsyncpa [#allocation5], 0  ;;  %s155_s9 = smov [#allocation3]  }
   0x2   :  { %s18_s10 = sshll.u32 %s155_s9, 4  ;;  %s19_s10 = int_to_ptr.vmem [resolvable:$true] %s18_s10 }
   0x3   :  { %s131_s11 = scalar_lea.vmem %s19_s10, 16  ;;  %s135_s12 = scalar_lea.vmem %s19_s10, 32 }
   0x4   :  { %p132_p0 = scmp.ne.s32.totalorder %s19_s10, %s131_s11  ;;  %p136_p1 = scmp.lt.s32.totalorder %s19_s10, %s19_s10 }
   0x5   :  { %p137_p2 = scmp.lt.s32.totalorder %s135_s12, %s131_s11 }
   0x7   :  { %p138_p3 = por %p137_p2, %p136_p1 }
   0x9   :  { %p139_p4 = pnand %p138_p3, %p132_p0 }
   0xb   :  { %142 = shalt.err (!%p139_p4)
}
   0xc   :  { %21 = dma.hbm_to_vmem [thread:$0]  %s182_s0, 16, %s19_s10, [#allocation4]  }
   0xd   :  { %151 = dma.done.wait [#allocation4], 16  }
   0xe   :  { %152 = vsyncadd [#allocation4], 4294967280  ;;  %v156_v0 = vmov 0.0   ;;  %v70_v1 = vlaneseq  ;;  %v48_v2 = vld [vmem:[%s183_s1] sm:$0x1]  ;;  %vm87_vm1 = vcmask 1040384  }
   0xf   :  { %46 = vst [vmem:[#allocation2] sm:$0x1] %v156_v0  ;;  %v117_v4 = vadd.f32 17.4, %v48_v2  ;;  %v47_v10 = vld [vmem:[#allocation3] sm:$0x1] }
  0x10   :  { %v71_v3 = vshrl.u32 %v70_v1, 7  ;;  %v73_v6 = vand.u32 127, %v70_v1  ;;  %s157_s1 = smov [#allocation6]  }
  0x11   :  { %v50_v5 = vmul.f32 0.057471264, %v117_v4 }
  0x12   :  { %v74_v7 = vmul.u32 128, %v71_v3 }
  0x13   :  { %v51_v8 = vsub.f32 1.0, %v50_v5 }
  0x14   :  { %v77_v11 = vadd.s32 %v74_v7, %v73_v6 }
  0x15   :  { %v52_v9 = vmax.f32 %v51_v8, 0.0 }
  0x16   :  { %vm79_vm0 = vcmp.lt.s32.totalorder %v77_v11, 8  ;;  %v78_v15 = vld [vmem:[#allocation2] sm:$0x1] }
  0x17   :  { %v53_v12 = vmin.f32 %v52_v9, 1.0 }
  0x19   :  { %v54_v13 = vsub.f32 %v47_v10, %v53_v12 }
  0x1b   :  { %v55_v14 = vmul.f32 %v54_v13, %v54_v13 }
  0x1d   :  { %v80_v16 = vsel %vm79_vm0, %v55_v14, 0.0 }
  0x1e   :  { %v81_v17 = vadd.f32 %v80_v16, %v78_v15 }
  0x20   :  { %82 = vst [vmem:[#allocation2] sm:$0x1] %v81_v17 }
  0x27   :  { %v86_v18 = vld [vmem:[#allocation2] sm:$0x1] }
  0x28   :  { %v88_v19 = vsel %vm87_vm1, %v86_v18, 0.0 }
  0x29   :  { %89 = vadd.xlane.f32.xlu0 %v88_v19 }
  0xb2   :  { %v90_v20 = vpop.xlane.xlu0 %89 }
  0xb3   :  { %v91_v21 = vrot.slane %v90_v20, 4 }
  0xb5   :  { %v92_v22 = vadd.f32 %v91_v21, %v90_v20 }
  0xb7   :  { %v93_v23 = vrot.slane %v92_v22, 2 }
  0xb9   :  { %v94_v24 = vadd.f32 %v93_v23, %v92_v22 }
  0xbb   :  { %v95_v25 = vrot.slane %v94_v24, 1 }
  0xbd   :  { %v96_v26 = vadd.f32 %v95_v25, %v94_v24 }
  0xbf   :  { %118 = vpush %v96_v26 }
  0xf0   :  { %s119_s0 = spop %118 }
  0xf1   :  { %99 = sst [smem:[#allocation6]] %s119_s0 }
  0xf2   :  { %107 = dma.smem_to_hbm %s157_s1, 16, %s184_s2, [#allocation5]  }
  0xf3   :  { %153 = dma.done.wait [#allocation5], 16  }
  0xf4   :  { %154 = vsyncadd [#allocation5], 4294967280 }
  0xf5   :  { %111 = sfence }
  0xf6   :  { %112 = vsyncpa [#allocation4], 1 }
  0xf7   :  { %113 = vsyncpa [#allocation5], 1 }

</bundles_post_ra>
